<compile_context>
chip_gen: v6e
topology: v6e:2x2x1
jax: 0.10.0
libtpu: 0.0.40
codegen_flags: <defaults>
</compile_context>

<pallas_src>
import functools

import jax
import jax.numpy as jnp
from jax.experimental import pallas as pl
from jax.experimental.pallas import tpu as pltpu

# (n_classes, energy_weight) per head.  Heads with n_classes > 1 use the
# classification energy; the n_classes == 1 head uses the regression energy.
HEAD_SPECS = ((4, 1.0), (3, 0.5), (1, 2.0))
SIGMA = 0.1


def _round_up(x, m):
    return ((x + m - 1) // m) * m


def ccf_kernel(z_ref, w_ref, b_ref, y_ref, out_ref, *, head_specs):
    z = z_ref[...]                      # [TB, D]    f32
    w = w_ref[...]                      # [D, Ctot]  f32 (resident across grid)
    b = b_ref[...]                      # [1, Ctot]  f32
    y = y_ref[...]                      # [TB, A]    f32

    tb = z.shape[0]
    ctot = w.shape[1]

    # Single fused matmul for all heads (MXU).
    logits_all = jnp.dot(z, w, preferred_element_type=jnp.float32) + b   # [TB, Ctot]

    # One iota for every head (hoisted: JAX does not CSE broadcast/iota).
    lane_idx = jax.lax.broadcasted_iota(jnp.int32, (tb, ctot), 1)

    energy = jnp.zeros((tb, 1), jnp.float32)
    off = 0
    for i, (c, wgt) in enumerate(head_specs):
        logits = logits_all[:, off:off + c]          # [TB, c]  (static slice)
        y_i = y[:, i:i + 1]                          # [TB, 1]
        if c > 1:
            # torch.gather(logits, 1, y) - logits.logsumexp(1)
            m = jnp.max(logits, axis=1, keepdims=True)
            lse = m + jnp.log(jnp.sum(jnp.exp(logits - m), axis=1, keepdims=True))
            onehot = (lane_idx[:, off:off + c]
                      == (y_i.astype(jnp.int32) + off)).astype(jnp.float32)
            picked = jnp.sum(logits * onehot, axis=1, keepdims=True)
            energy = energy + wgt * (picked - lse)
        else:
            # -||logits - y||^2 * 0.5 / sigma^2   (logits is [TB, 1])
            diff = logits - y_i
            energy = energy + wgt * (-(diff * diff) * 0.5 / (SIGMA ** 2))
        off += c

    # forward(): energy - 0.5 * ||z||^2  (norm over the feature dim)
    znorm2 = jnp.sum(z * z, axis=1, keepdims=True)
    out_ref[...] = energy - 0.5 * znorm2


def ccf_forward(z, y, w, b, head_specs=HEAD_SPECS, tb=512):
    """Returns per-sample energy, shape [B]."""
    B, D = z.shape
    A = y.shape[1]
    ctot = w.shape[1]

    # Batch tile: multiple of 8 (f32 sublane), capped at `tb` (v7x-safe default
    # 512; raise on v5e/v6e with their 128 MiB VMEM if desired).
    TB = min(tb, _round_up(B, 8))
    B_pad = _round_up(B, TB)
    if B_pad != B:
        # Zero padding: class index 0 is valid for every head; padded rows are
        # discarded below.
        z = jnp.pad(z, ((0, B_pad - B), (0, 0)))
        y = jnp.pad(y, ((0, B_pad - B), (0, 0)))

    n_cls_heads = sum(1 for c, _ in head_specs if c > 1)
    cost = pl.CostEstimate(
        flops=2 * B_pad * D * ctot + 2 * B_pad * D + 8 * B_pad * ctot,
        transcendentals=B_pad * ctot + B_pad * n_cls_heads,
        bytes_accessed=4 * (B_pad * D + D * ctot + ctot + B_pad * A + B_pad),
    )

    kernel = functools.partial(ccf_kernel, head_specs=head_specs)
    out = pl.pallas_call(
        kernel,
        out_shape=jax.ShapeDtypeStruct((B_pad, 1), jnp.float32),
        grid=(B_pad // TB,),
        in_specs=[
            pl.BlockSpec((TB, D), lambda i: (i, 0)),      # z: streamed per tile
            pl.BlockSpec((D, ctot), lambda i: (0, 0)),    # w: resident
            pl.BlockSpec((1, ctot), lambda i: (0, 0)),    # b: resident
            pl.BlockSpec((TB, A), lambda i: (i, 0)),      # y: streamed per tile
        ],
        out_specs=pl.BlockSpec((TB, 1), lambda i: (i, 0)),
        compiler_params=pltpu.CompilerParams(
            dimension_semantics=("parallel",),            # megacore on v7x
            vmem_limit_bytes=48 * 1024 * 1024,            # headroom under v7x 64 MiB
        ),
        cost_estimate=cost,
    )(z, w, b, y)
    return out[:B, 0]   # [B] energy per sample


def ccf_reference(z, y, w, b, head_specs=HEAD_SPECS):
    """Pure-JAX reference mirroring the PyTorch forward()."""
    logits_all = z @ w + b
    energy = jnp.zeros((z.shape[0],), jnp.float32)
    off = 0
    for i, (c, wgt) in enumerate(head_specs):
        logits = logits_all[:, off:off + c]
        if c > 1:
            lse = jax.scipy.special.logsumexp(logits, axis=1)
            picked = jnp.take_along_axis(
                logits, y[:, i:i + 1].astype(jnp.int32), axis=1)[:, 0]
            energy = energy + wgt * (picked - lse)
        else:
            diff = logits[:, 0] - y[:, i]
            energy = energy + wgt * (-(diff * diff) * 0.5 / (SIGMA ** 2))
        off += c
    return energy - 0.5 * jnp.sum(z * z, axis=1)


if __name__ == "__main__":
    B, D = 8, 32
    n_heads = len(HEAD_SPECS)
    ctot = sum(c for c, _ in HEAD_SPECS)

    key = jax.random.PRNGKey(0)
    kz, kw, kb, ky = jax.random.split(key, 4)

    z = jax.random.normal(kz, (B, D), dtype=jnp.float32)
    # Deterministic synthetic classifier weights (concatenated over heads).
    w = 0.1 * jax.random.normal(kw, (D, ctot), dtype=jnp.float32)
    b = 0.01 * jax.random.normal(kb, (1, ctot), dtype=jnp.float32)

    # y: classification columns hold integer class indices (as float),
    # regression column holds a float target.
    y_cols = []
    cls_keys = jax.random.split(ky, n_heads)
    for i, (c, _) in enumerate(HEAD_SPECS):
        if c > 1:
            col = jax.random.randint(cls_keys[i], (B, 1), 0, c).astype(jnp.float32)
        else:
            col = jax.random.normal(cls_keys[i], (B, 1), dtype=jnp.float32)
        y_cols.append(col)
    y = jnp.concatenate(y_cols, axis=1)   # [B, n_heads]

    out = ccf_forward(z, y, w, b)
    jax.block_until_ready(out)
    assert out.shape == (B,)

    ref = ccf_reference(z, y, w, b)
    assert jnp.allclose(out, ref, rtol=1e-4, atol=1e-4), (out, ref)

    print("KERNEL_OK")
</pallas_src>

<mosaic_0001>
module attributes {stable_mosaic.version = 11 : i64} {
  func.func @ccf_kernel(%arg0: i32, %arg1: memref<8x32xf32, #tpu.memory_space<vmem>>, %arg2: memref<32x8xf32, #tpu.memory_space<vmem>>, %arg3: memref<1x8xf32, #tpu.memory_space<vmem>>, %arg4: memref<8x3xf32, #tpu.memory_space<vmem>>, %arg5: memref<8x1xf32, #tpu.memory_space<vmem>>) attributes {dimension_semantics = [#tpu.dimension_semantics<parallel>], iteration_bounds = array<i64: 1>, scalar_prefetch = 0 : i64, scratch_operands = 0 : i64, tpu.core_type = #tpu.core_type<tc>, window_params = [{transform_indices = @transform_0, window_bounds = array<i64: 8, 32>}, {pipeline_mode = #tpu.pipeline_mode<synchronous>, transform_indices = @transform_1, window_bounds = array<i64: 32, 8>}, {pipeline_mode = #tpu.pipeline_mode<synchronous>, transform_indices = @transform_2, window_bounds = array<i64: 1, 8>}, {transform_indices = @transform_3, window_bounds = array<i64: 8, 3>}, {transform_indices = @transform_4, window_bounds = array<i64: 8, 1>}]} {
    %c0 = arith.constant 0 : index
    %c0_0 = arith.constant 0 : index
    %0 = vector.load %arg1[%c0, %c0_0] : memref<8x32xf32, #tpu.memory_space<vmem>>, vector<8x32xf32>
    %c0_1 = arith.constant 0 : index
    %c0_2 = arith.constant 0 : index
    %1 = vector.load %arg2[%c0_1, %c0_2] : memref<32x8xf32, #tpu.memory_space<vmem>>, vector<32x8xf32>
    %c0_3 = arith.constant 0 : index
    %c0_4 = arith.constant 0 : index
    %2 = vector.load %arg3[%c0_3, %c0_4] : memref<1x8xf32, #tpu.memory_space<vmem>>, vector<1x8xf32>
    %c0_5 = arith.constant 0 : index
    %c0_6 = arith.constant 0 : index
    %3 = vector.load %arg4[%c0_5, %c0_6] : memref<8x3xf32, #tpu.memory_space<vmem>>, vector<8x3xf32>
    %cst = arith.constant dense<0.000000e+00> : vector<8x8xf32>
    %4 = tpu.matmul %0, %1, %cst {dimension_numbers = #tpu.dot_dimension_numbers<[1], [0], [0], [1], [0, 0, 1, 1], [], []>} : vector<8x32xf32>, vector<32x8xf32>, vector<8x8xf32> -> vector<8x8xf32>
    %5 = vector.broadcast %2 : vector<1x8xf32> to vector<8x8xf32>
    %6 = arith.addf %4, %5 : vector<8x8xf32>
    %7 = tpu.iota {dimensions = array<i32: 1>} : vector<8x8xi32>
    %cst_7 = arith.constant 0.000000e+00 : f32
    %8 = vector.broadcast %cst_7 : f32 to vector<8x1xf32>
    %9 = vector.extract_strided_slice %6 {offsets = [0, 0], sizes = [8, 4], strides = [1, 1]} : vector<8x8xf32> to vector<8x4xf32>
    %10 = vector.extract_strided_slice %3 {offsets = [0, 0], sizes = [8, 1], strides = [1, 1]} : vector<8x3xf32> to vector<8x1xf32>
    %cst_8 = arith.constant dense<0xFF800000> : vector<8xf32>
    %11 = vector.multi_reduction <maximumf>, %9, %cst_8 [1] : vector<8x4xf32> to vector<8xf32>
    %12 = vector.shape_cast %11 : vector<8xf32> to vector<8x1xf32>
    %13 = vector.broadcast %12 : vector<8x1xf32> to vector<8x4xf32>
    %14 = arith.subf %9, %13 : vector<8x4xf32>
    %15 = math.exp %14 : vector<8x4xf32>
    %cst_9 = arith.constant dense<0.000000e+00> : vector<8xf32>
    %16 = vector.multi_reduction <add>, %15, %cst_9 [1] : vector<8x4xf32> to vector<8xf32>
    %17 = vector.shape_cast %16 : vector<8xf32> to vector<8x1xf32>
    %18 = math.log %17 : vector<8x1xf32>
    %19 = arith.addf %12, %18 : vector<8x1xf32>
    %20 = vector.extract_strided_slice %7 {offsets = [0, 0], sizes = [8, 4], strides = [1, 1]} : vector<8x8xi32> to vector<8x4xi32>
    %21 = arith.fptosi %10 : vector<8x1xf32> to vector<8x1xi32>
    %c0_i32 = arith.constant 0 : i32
    %22 = vector.broadcast %c0_i32 : i32 to vector<8x1xi32>
    %23 = arith.addi %21, %22 : vector<8x1xi32>
    %24 = vector.broadcast %23 : vector<8x1xi32> to vector<8x4xi32>
    %25 = arith.cmpi eq, %20, %24 : vector<8x4xi32>
    %26 = arith.extui %25 : vector<8x4xi1> to vector<8x4xi32>
    %27 = arith.sitofp %26 : vector<8x4xi32> to vector<8x4xf32>
    %28 = arith.mulf %9, %27 : vector<8x4xf32>
    %cst_10 = arith.constant dense<0.000000e+00> : vector<8xf32>
    %29 = vector.multi_reduction <add>, %28, %cst_10 [1] : vector<8x4xf32> to vector<8xf32>
    %30 = vector.shape_cast %29 : vector<8xf32> to vector<8x1xf32>
    %31 = arith.subf %30, %19 : vector<8x1xf32>
    %cst_11 = arith.constant 1.000000e+00 : f32
    %32 = vector.broadcast %cst_11 : f32 to vector<8x1xf32>
    %33 = arith.mulf %32, %31 : vector<8x1xf32>
    %34 = arith.addf %8, %33 : vector<8x1xf32>
    %35 = vector.extract_strided_slice %6 {offsets = [0, 4], sizes = [8, 3], strides = [1, 1]} : vector<8x8xf32> to vector<8x3xf32>
    %36 = vector.extract_strided_slice %3 {offsets = [0, 1], sizes = [8, 1], strides = [1, 1]} : vector<8x3xf32> to vector<8x1xf32>
    %cst_12 = arith.constant dense<0xFF800000> : vector<8xf32>
    %37 = vector.multi_reduction <maximumf>, %35, %cst_12 [1] : vector<8x3xf32> to vector<8xf32>
    %38 = vector.shape_cast %37 : vector<8xf32> to vector<8x1xf32>
    %39 = vector.broadcast %38 : vector<8x1xf32> to vector<8x3xf32>
    %40 = arith.subf %35, %39 : vector<8x3xf32>
    %41 = math.exp %40 : vector<8x3xf32>
    %cst_13 = arith.constant dense<0.000000e+00> : vector<8xf32>
    %42 = vector.multi_reduction <add>, %41, %cst_13 [1] : vector<8x3xf32> to vector<8xf32>
    %43 = vector.shape_cast %42 : vector<8xf32> to vector<8x1xf32>
    %44 = math.log %43 : vector<8x1xf32>
    %45 = arith.addf %38, %44 : vector<8x1xf32>
    %46 = vector.extract_strided_slice %7 {offsets = [0, 4], sizes = [8, 3], strides = [1, 1]} : vector<8x8xi32> to vector<8x3xi32>
    %47 = arith.fptosi %36 : vector<8x1xf32> to vector<8x1xi32>
    %c4_i32 = arith.constant 4 : i32
    %48 = vector.broadcast %c4_i32 : i32 to vector<8x1xi32>
    %49 = arith.addi %47, %48 : vector<8x1xi32>
    %50 = vector.broadcast %49 : vector<8x1xi32> to vector<8x3xi32>
    %51 = arith.cmpi eq, %46, %50 : vector<8x3xi32>
    %52 = arith.extui %51 : vector<8x3xi1> to vector<8x3xi32>
    %53 = arith.sitofp %52 : vector<8x3xi32> to vector<8x3xf32>
    %54 = arith.mulf %35, %53 : vector<8x3xf32>
    %cst_14 = arith.constant dense<0.000000e+00> : vector<8xf32>
    %55 = vector.multi_reduction <add>, %54, %cst_14 [1] : vector<8x3xf32> to vector<8xf32>
    %56 = vector.shape_cast %55 : vector<8xf32> to vector<8x1xf32>
    %57 = arith.subf %56, %45 : vector<8x1xf32>
    %cst_15 = arith.constant 5.000000e-01 : f32
    %58 = vector.broadcast %cst_15 : f32 to vector<8x1xf32>
    %59 = arith.mulf %58, %57 : vector<8x1xf32>
    %60 = arith.addf %34, %59 : vector<8x1xf32>
    %61 = vector.extract_strided_slice %6 {offsets = [0, 7], sizes = [8, 1], strides = [1, 1]} : vector<8x8xf32> to vector<8x1xf32>
    %62 = vector.extract_strided_slice %3 {offsets = [0, 2], sizes = [8, 1], strides = [1, 1]} : vector<8x3xf32> to vector<8x1xf32>
    %63 = arith.subf %61, %62 : vector<8x1xf32>
    %64 = arith.mulf %63, %63 : vector<8x1xf32>
    %cst_16 = arith.constant 0.000000e+00 : f32
    %65 = vector.broadcast %cst_16 : f32 to vector<8x1xf32>
    %66 = arith.subf %65, %64 : vector<8x1xf32>
    %cst_17 = arith.constant 5.000000e-01 : f32
    %67 = vector.broadcast %cst_17 : f32 to vector<8x1xf32>
    %68 = arith.mulf %66, %67 : vector<8x1xf32>
    %cst_18 = arith.constant 0.00999999977 : f32
    %69 = vector.broadcast %cst_18 : f32 to vector<8x1xf32>
    %70 = arith.divf %68, %69 : vector<8x1xf32>
    %cst_19 = arith.constant 2.000000e+00 : f32
    %71 = vector.broadcast %cst_19 : f32 to vector<8x1xf32>
    %72 = arith.mulf %71, %70 : vector<8x1xf32>
    %73 = arith.addf %60, %72 : vector<8x1xf32>
    %74 = arith.mulf %0, %0 : vector<8x32xf32>
    %cst_20 = arith.constant dense<0.000000e+00> : vector<8xf32>
    %75 = vector.multi_reduction <add>, %74, %cst_20 [1] : vector<8x32xf32> to vector<8xf32>
    %76 = vector.shape_cast %75 : vector<8xf32> to vector<8x1xf32>
    %cst_21 = arith.constant 5.000000e-01 : f32
    %77 = vector.broadcast %cst_21 : f32 to vector<8x1xf32>
    %78 = arith.mulf %77, %76 : vector<8x1xf32>
    %79 = arith.subf %73, %78 : vector<8x1xf32>
    %c0_22 = arith.constant 0 : index
    %c0_23 = arith.constant 0 : index
    %80 = vector.load %arg5[%c0_22, %c0_23] : memref<8x1xf32, #tpu.memory_space<vmem>>, vector<8x1xf32>
    tpu.vector_store %arg5[%c0_22, %c0_23], %79 {strides = array<i32>} : memref<8x1xf32, #tpu.memory_space<vmem>>, vector<8x1xf32>,
    return
  }
  func.func @transform_0(%arg0: i32) -> (i32, i32) {
    %c0_i32 = arith.constant 0 : i32
    %c0_i32_0 = arith.constant 0 : i32
    return %arg0, %c0_i32 : i32, i32
  }
  func.func @transform_1(%arg0: i32) -> (i32, i32) {
    %c0_i32 = arith.constant 0 : i32
    %c0_i32_0 = arith.constant 0 : i32
    %c0_i32_1 = arith.constant 0 : i32
    return %c0_i32, %c0_i32_0 : i32, i32
  }
  func.func @transform_2(%arg0: i32) -> (i32, i32) {
    %c0_i32 = arith.constant 0 : i32
    %c0_i32_0 = arith.constant 0 : i32
    %c0_i32_1 = arith.constant 0 : i32
    return %c0_i32, %c0_i32_0 : i32, i32
  }
  func.func @transform_3(%arg0: i32) -> (i32, i32) {
    %c0_i32 = arith.constant 0 : i32
    %c0_i32_0 = arith.constant 0 : i32
    return %arg0, %c0_i32 : i32, i32
  }
  func.func @transform_4(%arg0: i32) -> (i32, i32) {
    %c0_i32 = arith.constant 0 : i32
    %c0_i32_0 = arith.constant 0 : i32
    return %arg0, %c0_i32 : i32, i32
  }
}

</mosaic_0001>

<bundles_post_ra>
// kernel: tpu_custom_call.1
= control target key start
LH: loop header
LB: loop body
LE: loop exit
PB: predicated region body
PF: predicated region fallthrough
CT: control target
= control target key end

     0   :  { %v235_v0 = vmov 0.0   ;;  %vm236_vm0 = vmmov 0   ;;  %vm30_vm1 = vcmask 261120   ;;  %v237_v6 = vmov 1   ;;  %s241_s27 = smov 121   ;;  %s303_s1 = inlined_call_operand.vmem [shape: f32[32,8], index: 1, kind: input, shape index: {}]   ;;  %s304_s0 = inlined_call_operand.vmem [shape: f32[8,32], index: 0, kind: input, shape index: {}]   ;;  %s305_s2 = inlined_call_operand.vmem [shape: f32[1,8], index: 2, kind: input, shape index: {}]   ;;  %s306_s3 = inlined_call_operand.vmem [shape: f32[8,3], index: 3, kind: input, shape index: {}]   ;;  %s307_s4 = inlined_call_operand.vmem [shape: f32[8,1], index: 4, kind: output, shape index: {}]  }
   0x1   :  { %205 = vmatprep.subr.mxu0 %v235_v0  ;;  %v21_v1 = vld [vmem:[%s303_s1 + $0x18] sm:$0xff]  ;;  %v20_v2 = vld [vmem:[%s303_s1 + $0x10] sm:$0xff]  ;;  %213 = vmatprep.mubr.msk.f32.mxu0 %vm236_vm0, %v235_v0  ;;  %v19_v3 = vld [vmem:[%s303_s1 + $0x8] sm:$0xff]  ;;  %vm132_vm2 = vcmask 56352   ;;  %vm106_vm3 = vcmask 31744   ;;  %v238_v17 = vmov 0   ;;  %v104_v24 = vlaneseq }
   0x2   :  { %206 = vmatpush3.msra.mxu0 %v21_v1  ;;  %v18_v4 = vld [vmem:[%s303_s1] sm:$0xff]  ;;  %225 = vset.pattern.permute.xlu0 %v237_v6  ;;  %vm143_vm6 = vcmask 23552   ;;  %vm190_vm7 = vcmask 7168  }
   0x3   :  { %207 = vmatprep.subr.mxu0 %v235_v0  ;;  %v17_v5 = vld [vmem:[%s304_s0] sm:$0xff]  ;;  %226 = vset.pattern.permute.xlu1 %v238_v17  ;;  %v105_v25 = vand.u32 127, %v104_v24 }
   0x4   :  { %208 = vmatpush3.msra.mxu0 %v20_v2  ;;  %v196_v7 = vld [vmem:[%s305_s2] ss:$0 sm:$0xff]  ;;  %s239_s2 = smov 124   ;;  %v180_v32 = vmul.f32 %v17_v5, %v17_v5 }
   0x5   :  { %209 = vmatprep.subr.mxu0 %v235_v0  ;;  %v23_v13 = vld [vmem:[%s306_s3] sm:$0xff]  ;;  %s240_s3 = smov 5  }
   0x6   :  { %210 = vmatpush3.msra.mxu0 %v19_v3  ;;  %v216_v14 = vtrunc.f32 %v23_v13  ;;  %v181_v33 = vsel %vm30_vm1, %v180_v32, 0.0 }
   0x7   :  { %211 = vmatprep.subr.mxu0 %v235_v0 }
   0x8   :  { %212 = vmatpush3.msra.mxu0 %v18_v4  ;;  %v217_v15 = vcvt.f32.s32 %v216_v14 }
   0x9   :  { %214 = vmatmul.mubr.msk.f32.vlgmr.msra.gmra.mxu0 %vm30_vm1, %v17_v5 }
   0xa   :  { %v150_v16 = vadd.s32 4, %v217_v15 }
  0xc9   :  { %v100_v8 = vpop.f32.mrf.mxu0 }
  0xca   :  { %v101_v9 = vadd.f32 %v196_v7, %v100_v8 }
  0xcb   :  { %v215_v10 = vpop.f32.mrf.mxu0 }
  0xcc   :  { %v133_v11 = vsel %vm132_vm2, %v101_v9, -inf  ;;  %v107_v12 = vsel %vm106_vm3, %v101_v9, -inf }
  0xcd   :  { %134 = vmax.xlane.f32.xlu0 %v133_v11  ;;  %108 = vmax.xlane.f32.xlu1 %v107_v12 }
  0xe3   :  { %152 = vperm.xlu0 %225, %v150_v16  }
 0x156   :  { %v135_v18 = vpop.xlane.xlu0 %134  ;;  %v109_v19 = vpop.xlane.xlu1 %108 }
 0x157   :  { %v136_v20 = vsub.f32 %v101_v9, %v135_v18  ;;  %v110_v21 = vsub.f32 %v101_v9, %v109_v19 }
 0x159   :  { %v137_v22 = vmul.f32 1.442695, %v136_v20  ;;  %v111_v23 = vmul.f32 1.442695, %v110_v21 }
 0x15b   :  { %227 = vpow2.f32 %v137_v22 }
 0x15c   :  { %229 = vpow2.f32 %v111_v23 }
 0x15e   :  { %v153_v26 = vpop.permute.xlu0 %152 }
 0x15f   :  { %vm154_vm4 = vcmp.eq.s32.totalorder %v105_v25, %v153_v26 }
 0x160   :  { %v199_v30 = vsel %vm154_vm4, 1.0, %v235_v0 }
 0x161   :  { %v157_v31 = vmul.f32 %v199_v30, %v101_v9 }
 0x168   :  { %v228_v27 = vpop.eup %227 }
 0x169   :  { %v230_v28 = vpop.eup %229  ;;  %140 = vrot.lane.b32.xlu1 %v228_v27, %s239_s2 }
 0x16a   :  { %v113_v29 = vsel %vm106_vm3, %v230_v28, 0.0 }
 0x16b   :  { %114 = vadd.xlane.f32.xlu0 %v113_v29 }
 0x16d   :  { %121 = vperm.xlu1 %226, %v217_v15  }
 0x16f   :  { %182 = vadd.xlane.f32.xlu0 %v181_v33 }
 0x171   :  { %159 = vrot.lane.b32.xlu1 %v157_v31, %s239_s2 }
 0x1db   :  { %v141_v34 = vpop.permute.xlu1 %140 }
 0x1dc   :  { %v144_v41 = vsel %vm143_vm6, %v141_v34, 0.0 }
 0x1e8   :  { %v122_v35 = vpop.permute.xlu1 %121 }
 0x1e9   :  { %vm123_vm5 = vcmp.eq.s32.totalorder %v105_v25, %v122_v35 }
 0x1ea   :  { %v198_v36 = vsel %vm123_vm5, 1.0, %v235_v0 }
 0x1eb   :  { %v126_v39 = vmul.f32 %v198_v36, %v101_v9 }
 0x1ec   :  { %v160_v37 = vpop.permute.xlu1 %159 }
 0x1ed   :  { %v162_v38 = vsel %vm143_vm6, %v160_v37, 0.0  ;;  %v127_v40 = vsel %vm106_vm3, %v126_v39, 0.0 }
 0x1ee   :  { %163 = vadd.xlane.f32.xlu1 %v162_v38 }
 0x1f2   :  { %128 = vadd.xlane.f32.xlu1 %v127_v40 }
 0x1f4   :  { %v115_v43 = vpop.xlane.xlu0 %114 }
 0x1f5   :  { %231 = vlog2.f32 %v115_v43 }
 0x1f6   :  { %145 = vadd.xlane.f32.xlu1 %v144_v41 }
 0x1f8   :  { %v183_v59 = vpop.xlane.xlu0 %182 }
 0x1f9   :  { %v184_v0 = vmul.f32 0.5, %v183_v59 }
 0x202   :  { %v232_v50 = vpop.eup %231 }
 0x203   :  { %v117_v52 = vmul.f32 0.6931472, %v232_v50 }
 0x205   :  { %v118_v56 = vadd.f32 %v117_v52, %v109_v19 }
 0x207   :  { %169 = vrot.lane.b32.xlu1 %v23_v13, %s240_s3 }
 0x277   :  { %v164_v42 = vpop.xlane.xlu1 %163 }
 0x27b   :  { %v129_v44 = vpop.xlane.xlu1 %128 }
 0x27c   :  { %v130_v60 = vsub.f32 %v129_v44, %v118_v56 }
 0x27f   :  { %v146_v45 = vpop.xlane.xlu1 %145 }
 0x280   :  { %233 = vlog2.f32 %v146_v45 }
 0x283   :  { %v170_v46 = vpop.permute.xlu1 %169 }
 0x284   :  { %v172_v47 = vsub.f32 %v101_v9, %v170_v46 }
 0x286   :  { %v173_v48 = vmul.f32 %v172_v47, %v172_v47 }
 0x288   :  { %v174_v49 = vsub.f32 0.0, %v173_v48 }
 0x28a   :  { %v175_v54 = vmul.f32 0.5, %v174_v49 }
 0x28c   :  { %v177_v58 = vmul.f32 100.0, %v175_v54 }
 0x28d   :  { %v234_v51 = vpop.eup %233 }
 0x28e   :  { %v148_v53 = vmul.f32 0.6931472, %v234_v51  ;;  %v178_v62 = vmul.f32 2.0, %v177_v58 }
 0x290   :  { %v149_v55 = vadd.f32 %v148_v53, %v135_v18 }
 0x292   :  { %v165_v57 = vsub.f32 %v164_v42, %v149_v55 }
 0x294   :  { %v166_v61 = vmul.f32 0.5, %v165_v57 }
 0x296   :  { %v167_v63 = vadd.f32 %v166_v61, %v130_v60 }
 0x298   :  { %v179_v1 = vadd.f32 %v178_v62, %v167_v63 }
 0x29a   :  { %v185_v2 = vsub.f32 %v179_v1, %v184_v0 }
 0x29c   :  { %187 = vrot.lane.b32.xlu0 %v185_v2, %s241_s27 }
 0x30e   :  { %v188_v3 = vpop.permute.xlu0 %187 }
 0x30f   :  { %191 = vst.msk [vmem:[%s307_s4] sm:$0xff] %vm190_vm7, %v188_v3 }

</bundles_post_ra>
